<compile_context>
chip_gen: v7x
topology: tpu7x:2x2x1
jax: 0.10.0
libtpu: 0.0.40
codegen_flags: <defaults>
</compile_context>

<pallas_src>
import functools

import jax
import jax.numpy as jnp
from jax import lax
from jax.experimental import pallas as pl
from jax.experimental.pallas import tpu as pltpu

BN_EPS = 1e-5


# ---------------------------------------------------------------------------
# Pallas kernel: `nb` images per grid step, channels-on-sublane layout.
# ---------------------------------------------------------------------------
def fire_kernel(x_ref, wsq_ref, bsq_ref, wex_ref, bex_ref, out_ref, *, H, W, nb):
    HW = H * W
    P = W + 1                                   # flat zero-pad covers |k| <= W+1
    cs = wsq_ref.shape[0]

    # Edge masks for horizontal taps (dx = -1 / +1).  Vertical out-of-range
    # taps are zeroed by the flat padding below, so only 2 masks are needed.
    ww = lax.broadcasted_iota(jnp.int32, (1, HW), 1) % W
    mask_l = jnp.where(ww > 0, 1.0, 0.0)        # source col w-1 valid
    mask_r = jnp.where(ww < W - 1, 1.0, 0.0)    # source col w+1 valid

    wsq = wsq_ref[...]                          # (Cs, Cin)       bf16
    wex = wex_ref[...]                          # (Cout, 9*Cs)    bf16
    bsq = bsq_ref[...]                          # (Cs, 1)         f32
    bex = bex_ref[...]                          # (Cout, 1)       f32
    zpad = jnp.zeros((cs, P), jnp.float32)

    for i in range(nb):                         # static unroll over images
        x = x_ref[i]                            # (Cin, HW) bf16

        # ---- squeeze 1x1 conv (+ folded BN) + ReLU, f32 accumulation ----
        s = jnp.dot(wsq, x, preferred_element_type=jnp.float32)
        s = jnp.maximum(s + bsq, 0.0)           # (Cs, HW) f32

        # ---- im2col for the 3x3 taps (padding=1) ----
        # Zero-padded flat squeeze map; tap k = dy*W + dx is a static
        # lane-offset slice of it.
        spf = jnp.concatenate([zpad, s, zpad], axis=1)      # (Cs, HW + 2P)
        patches = []
        for t in range(9):                      # t = (dy+1)*3 + (dx+1)
            dy, dx = t // 3 - 1, t % 3 - 1
            k = dy * W + dx
            patch = s if k == 0 else spf[:, P + k:P + k + HW]
            if dx == -1:
                patch = patch * mask_l
            elif dx == 1:
                patch = patch * mask_r
            patches.append(patch)
        cols = jnp.concatenate(patches, axis=0)             # (9*Cs, HW) f32

        # ---- fused expand: one matmul yields [expand_1x1 ; expand_3x3] ----
        out = jnp.dot(wex, cols.astype(wex.dtype),
                      preferred_element_type=jnp.float32)   # (Cout, HW) f32
        out_ref[i] = jnp.maximum(out + bex, 0.0).astype(out_ref.dtype)


# ---------------------------------------------------------------------------
# Parameter setup (deterministic, PyTorch-convention shapes) + BN folding
# ---------------------------------------------------------------------------
def init_fire_params(key, cin, cs, ce1, ce3):
    ks = jax.random.split(key, 9)

    def conv_w(k, o, i, kh, kw):
        bound = 1.0 / jnp.sqrt(i * kh * kw)
        return jax.random.uniform(k, (o, i, kh, kw), jnp.float32, -bound, bound)

    def conv_b(k, o, fan_in):
        bound = 1.0 / jnp.sqrt(fan_in)
        return jax.random.uniform(k, (o,), jnp.float32, -bound, bound)

    def bn_params(k, c):
        k1, k2, k3, k4 = jax.random.split(k, 4)
        gamma = 1.0 + 0.1 * jax.random.normal(k1, (c,), jnp.float32)
        beta = 0.1 * jax.random.normal(k2, (c,), jnp.float32)
        mean = 0.1 * jax.random.normal(k3, (c,), jnp.float32)
        var = 0.5 + 0.1 * jnp.abs(jax.random.normal(k4, (c,), jnp.float32))
        return gamma, beta, mean, var

    return dict(
        wsq=conv_w(ks[0], cs, cin, 1, 1), bsq=conv_b(ks[1], cs, cin),
        bnsq=bn_params(ks[2], cs),
        we1=conv_w(ks[3], ce1, cs, 1, 1), be1=conv_b(ks[4], ce1, cs),
        bne1=bn_params(ks[5], ce1),
        we3=conv_w(ks[6], ce3, cs, 3, 3), be3=conv_b(ks[7], ce3, cs * 9),
        bne3=bn_params(ks[8], ce3),
    )


def fold_bn(w, b, bn):
    gamma, beta, mean, var = bn
    scale = gamma / jnp.sqrt(var + BN_EPS)
    wf = w * scale[:, None, None, None]
    bf = (b - mean) * scale + beta
    return wf, bf


# ---------------------------------------------------------------------------
# Wrapper: NCHW in / NCHW out, matching the PyTorch module semantics.
# ---------------------------------------------------------------------------
def fire_forward(x_nchw, params, *, images_per_step=1):
    N, cin, H, W = x_nchw.shape
    HW = H * W

    wsq, bsq = fold_bn(params['wsq'], params['bsq'], params['bnsq'])
    we1, be1 = fold_bn(params['we1'], params['be1'], params['bne1'])
    we3, be3 = fold_bn(params['we3'], params['be3'], params['bne3'])

    cs, ce1, ce3 = wsq.shape[0], we1.shape[0], we3.shape[0]
    cout = ce1 + ce3

    # Squeeze weight as a (Cs, Cin) matrix (channels on rows / sublanes).
    wsq_m = wsq[:, :, 0, 0].astype(jnp.bfloat16)

    # Fused expand weight (Cout, 9*Cs):
    #   rows [0:ce1]  = expand_1x1 weights placed in the centre-tap columns,
    #   rows [ce1: ]  = expand_3x3 weights flattened tap-major (matches the
    #                   im2col ordering built in the kernel).
    w3_m = jnp.transpose(we3, (0, 2, 3, 1)).reshape(ce3, 9 * cs)
    w1_m = jnp.zeros((ce1, 9 * cs), we1.dtype).at[:, 4 * cs:5 * cs].set(
        we1[:, :, 0, 0])
    wex_m = jnp.concatenate([w1_m, w3_m], axis=0).astype(jnp.bfloat16)

    bsq_m = bsq.reshape(cs, 1).astype(jnp.float32)
    bex_m = jnp.concatenate([be1, be3]).reshape(cout, 1).astype(jnp.float32)

    # NCHW -> (N, Cin, H*W): free reshape, spatial lands on the lane axis.
    x_flat = x_nchw.reshape(N, cin, HW).astype(jnp.bfloat16)

    nb = images_per_step
    assert N % nb == 0, "images_per_step must divide the batch size"
    kernel = functools.partial(fire_kernel, H=H, W=W, nb=nb)

    out_flat = pl.pallas_call(
        kernel,
        out_shape=jax.ShapeDtypeStruct((N, cout, HW), jnp.float32),
        grid=(N // nb,),
        in_specs=[
            pl.BlockSpec((nb, cin, HW), lambda n: (n, 0, 0)),
            pl.BlockSpec((cs, cin), lambda n: (0, 0)),
            pl.BlockSpec((cs, 1), lambda n: (0, 0)),
            pl.BlockSpec((cout, 9 * cs), lambda n: (0, 0)),
            pl.BlockSpec((cout, 1), lambda n: (0, 0)),
        ],
        out_specs=pl.BlockSpec((nb, cout, HW), lambda n: (n, 0, 0)),
        compiler_params=pltpu.CompilerParams(
            dimension_semantics=("parallel",)),
    )(x_flat, wsq_m, bsq_m, wex_m, bex_m)

    return out_flat.reshape(N, cout, H, W)                  # already NCHW


# ---------------------------------------------------------------------------
# Plain-JAX reference (lax conv, NCHW, f32, un-folded BN) for correctness.
# ---------------------------------------------------------------------------
def fire_reference(x_nchw, params):
    def conv_bn_relu(x, w, b, bn, pad):
        y = jax.lax.conv_general_dilated(
            x, w, (1, 1), [(pad, pad), (pad, pad)],
            dimension_numbers=('NCHW', 'OIHW', 'NCHW'))
        y = y + b[None, :, None, None]
        gamma, beta, mean, var = bn
        y = (y - mean[None, :, None, None]) / jnp.sqrt(
            var[None, :, None, None] + BN_EPS)
        y = y * gamma[None, :, None, None] + beta[None, :, None, None]
        return jnp.maximum(y, 0.0)

    s = conv_bn_relu(x_nchw, params['wsq'], params['bsq'], params['bnsq'], 0)
    e1 = conv_bn_relu(s, params['we1'], params['be1'], params['bne1'], 0)
    e3 = conv_bn_relu(s, params['we3'], params['be3'], params['bne3'], 1)
    return jnp.concatenate([e1, e3], axis=1)


if __name__ == "__main__":
    key = jax.random.PRNGKey(0)
    k_x, k_p = jax.random.split(key)

    # Fire(in_channel=4, squeeze_channel=4, expand1x1_planes=8, expand3x3_planes=8)
    N, Cin, H, W = 2, 4, 16, 16
    Cs, Ce1, Ce3 = 4, 8, 8

    x = jax.random.normal(k_x, (N, Cin, H, W), jnp.float32)   # NCHW, like PyTorch
    params = init_fire_params(k_p, Cin, Cs, Ce1, Ce3)

    out = fire_forward(x, params)
    out = jax.block_until_ready(out)

    ref = jax.block_until_ready(fire_reference(x, params))
    assert out.shape == (N, Ce1 + Ce3, H, W), out.shape
    # bf16 MXU operands with f32 accumulation vs a pure-f32 reference:
    # tolerance reflects bf16 operand rounding, not structural error.
    max_diff = jnp.max(jnp.abs(out - ref))
    assert jnp.allclose(out, ref, atol=2e-2, rtol=2e-2), \
        f"max abs diff {max_diff}"

    print("KERNEL_OK")
</pallas_src>

<mosaic_0001>
module attributes {stable_mosaic.version = 11 : i64} {
  func.func @fire_kernel(%arg0: i32, %arg1: memref<1x4x256xbf16, #tpu.memory_space<vmem>>, %arg2: memref<4x4xbf16, #tpu.memory_space<vmem>>, %arg3: memref<4x1xf32, #tpu.memory_space<vmem>>, %arg4: memref<16x36xbf16, #tpu.memory_space<vmem>>, %arg5: memref<16x1xf32, #tpu.memory_space<vmem>>, %arg6: memref<1x16x256xf32, #tpu.memory_space<vmem>>) attributes {dimension_semantics = [#tpu.dimension_semantics<parallel>], iteration_bounds = array<i64: 2>, scalar_prefetch = 0 : i64, scratch_operands = 0 : i64, tpu.core_type = #tpu.core_type<tc>, window_params = [{transform_indices = @transform_0, window_bounds = array<i64: 1, 4, 256>}, {pipeline_mode = #tpu.pipeline_mode<synchronous>, transform_indices = @transform_1, window_bounds = array<i64: 4, 4>}, {pipeline_mode = #tpu.pipeline_mode<synchronous>, transform_indices = @transform_2, window_bounds = array<i64: 4, 1>}, {pipeline_mode = #tpu.pipeline_mode<synchronous>, transform_indices = @transform_3, window_bounds = array<i64: 16, 36>}, {pipeline_mode = #tpu.pipeline_mode<synchronous>, transform_indices = @transform_4, window_bounds = array<i64: 16, 1>}, {transform_indices = @transform_5, window_bounds = array<i64: 1, 16, 256>}]} {
    %0 = tpu.iota {dimensions = array<i32: 1>} : vector<1x256xi32>
    %c16_i32 = arith.constant 16 : i32
    %c0_i32 = arith.constant 0 : i32
    %1 = arith.cmpi eq, %c16_i32, %c0_i32 : i32
    %c1_i32 = arith.constant 1 : i32
    %2 = arith.select %1, %c1_i32, %c16_i32 : i32
    %3 = vector.broadcast %2 : i32 to vector<1x256xi32>
    %4 = arith.remsi %0, %3 : vector<1x256xi32>
    %c0_i32_0 = arith.constant 0 : i32
    %5 = vector.broadcast %c0_i32_0 : i32 to vector<1x256xi32>
    %6 = arith.cmpi ne, %4, %5 : vector<1x256xi32>
    %c0_i32_1 = arith.constant 0 : i32
    %7 = vector.broadcast %c0_i32_1 : i32 to vector<1x256xi32>
    %8 = arith.cmpi slt, %4, %7 : vector<1x256xi32>
    %c0_i32_2 = arith.constant 0 : i32
    %9 = arith.cmpi slt, %2, %c0_i32_2 : i32
    %10 = vector.broadcast %9 : i1 to vector<1x256xi1>
    %11 = vector.broadcast %10 : vector<1x256xi1> to vector<1x256xi1>
    %12 = arith.xori %8, %11 : vector<1x256xi1>
    %13 = arith.andi %12, %6 : vector<1x256xi1>
    %14 = vector.broadcast %2 : i32 to vector<1x256xi32>
    %15 = arith.addi %4, %14 : vector<1x256xi32>
    %16 = arith.select %13, %15, %4 : vector<1x256xi1>, vector<1x256xi32>
    %c0_i32_3 = arith.constant 0 : i32
    %17 = vector.broadcast %c0_i32_3 : i32 to vector<1x256xi32>
    %18 = arith.cmpi sgt, %16, %17 : vector<1x256xi32>
    %cst = arith.constant 1.000000e+00 : f32
    %cst_4 = arith.constant 0.000000e+00 : f32
    %19 = vector.broadcast %cst : f32 to vector<1x256xf32>
    %20 = vector.broadcast %cst_4 : f32 to vector<1x256xf32>
    %21 = arith.select %18, %19, %20 : vector<1x256xi1>, vector<1x256xf32>
    %c15_i32 = arith.constant 15 : i32
    %22 = vector.broadcast %c15_i32 : i32 to vector<1x256xi32>
    %23 = arith.cmpi slt, %16, %22 : vector<1x256xi32>
    %cst_5 = arith.constant 1.000000e+00 : f32
    %cst_6 = arith.constant 0.000000e+00 : f32
    %24 = vector.broadcast %cst_5 : f32 to vector<1x256xf32>
    %25 = vector.broadcast %cst_6 : f32 to vector<1x256xf32>
    %26 = arith.select %23, %24, %25 : vector<1x256xi1>, vector<1x256xf32>
    %c0 = arith.constant 0 : index
    %c0_7 = arith.constant 0 : index
    %27 = vector.load %arg2[%c0, %c0_7] : memref<4x4xbf16, #tpu.memory_space<vmem>>, vector<4x4xbf16>
    %c0_8 = arith.constant 0 : index
    %c0_9 = arith.constant 0 : index
    %28 = vector.load %arg4[%c0_8, %c0_9] : memref<16x36xbf16, #tpu.memory_space<vmem>>, vector<16x36xbf16>
    %c0_10 = arith.constant 0 : index
    %c0_11 = arith.constant 0 : index
    %29 = vector.load %arg3[%c0_10, %c0_11] : memref<4x1xf32, #tpu.memory_space<vmem>>, vector<4x1xf32>
    %c0_12 = arith.constant 0 : index
    %c0_13 = arith.constant 0 : index
    %30 = vector.load %arg5[%c0_12, %c0_13] : memref<16x1xf32, #tpu.memory_space<vmem>>, vector<16x1xf32>
    %cst_14 = arith.constant 0.000000e+00 : f32
    %31 = vector.broadcast %cst_14 : f32 to vector<4x17xf32>
    %c0_15 = arith.constant 0 : index
    %c0_16 = arith.constant 0 : index
    %c0_17 = arith.constant 0 : index
    %32 = vector.load %arg1[%c0_15, %c0_16, %c0_17] : memref<1x4x256xbf16, #tpu.memory_space<vmem>>, vector<1x4x256xbf16>
    %33 = vector.shape_cast %32 : vector<1x4x256xbf16> to vector<4x256xbf16>
    %cst_18 = arith.constant dense<0.000000e+00> : vector<4x256xf32>
    %34 = tpu.matmul %27, %33, %cst_18 {dimension_numbers = #tpu.dot_dimension_numbers<[1], [0], [0], [1], [0, 0, 1, 1], [], []>} : vector<4x4xbf16>, vector<4x256xbf16>, vector<4x256xf32> -> vector<4x256xf32>
    %35 = vector.broadcast %29 : vector<4x1xf32> to vector<4x256xf32>
    %36 = arith.addf %34, %35 : vector<4x256xf32>
    %cst_19 = arith.constant 0.000000e+00 : f32
    %37 = vector.broadcast %cst_19 : f32 to vector<4x256xf32>
    %38 = arith.maximumf %36, %37 : vector<4x256xf32>
    %39 = tpu.concatenate %31, %38, %31 in 1 : vector<4x17xf32>, vector<4x256xf32>, vector<4x17xf32> -> vector<4x290xf32>
    %40 = vector.extract_strided_slice %39 {offsets = [0, 0], sizes = [4, 256], strides = [1, 1]} : vector<4x290xf32> to vector<4x256xf32>
    %41 = vector.broadcast %21 : vector<1x256xf32> to vector<4x256xf32>
    %42 = arith.mulf %40, %41 : vector<4x256xf32>
    %43 = vector.extract_strided_slice %39 {offsets = [0, 1], sizes = [4, 256], strides = [1, 1]} : vector<4x290xf32> to vector<4x256xf32>
    %44 = vector.extract_strided_slice %39 {offsets = [0, 2], sizes = [4, 256], strides = [1, 1]} : vector<4x290xf32> to vector<4x256xf32>
    %45 = vector.broadcast %26 : vector<1x256xf32> to vector<4x256xf32>
    %46 = arith.mulf %44, %45 : vector<4x256xf32>
    %47 = vector.extract_strided_slice %39 {offsets = [0, 16], sizes = [4, 256], strides = [1, 1]} : vector<4x290xf32> to vector<4x256xf32>
    %48 = vector.broadcast %21 : vector<1x256xf32> to vector<4x256xf32>
    %49 = arith.mulf %47, %48 : vector<4x256xf32>
    %50 = vector.extract_strided_slice %39 {offsets = [0, 18], sizes = [4, 256], strides = [1, 1]} : vector<4x290xf32> to vector<4x256xf32>
    %51 = vector.broadcast %26 : vector<1x256xf32> to vector<4x256xf32>
    %52 = arith.mulf %50, %51 : vector<4x256xf32>
    %53 = vector.extract_strided_slice %39 {offsets = [0, 32], sizes = [4, 256], strides = [1, 1]} : vector<4x290xf32> to vector<4x256xf32>
    %54 = vector.broadcast %21 : vector<1x256xf32> to vector<4x256xf32>
    %55 = arith.mulf %53, %54 : vector<4x256xf32>
    %56 = vector.extract_strided_slice %39 {offsets = [0, 33], sizes = [4, 256], strides = [1, 1]} : vector<4x290xf32> to vector<4x256xf32>
    %57 = vector.extract_strided_slice %39 {offsets = [0, 34], sizes = [4, 256], strides = [1, 1]} : vector<4x290xf32> to vector<4x256xf32>
    %58 = vector.broadcast %26 : vector<1x256xf32> to vector<4x256xf32>
    %59 = arith.mulf %57, %58 : vector<4x256xf32>
    %60 = tpu.concatenate %42, %43, %46, %49, %38, %52, %55, %56, %59 in 0 : vector<4x256xf32>, vector<4x256xf32>, vector<4x256xf32>, vector<4x256xf32>, vector<4x256xf32>, vector<4x256xf32>, vector<4x256xf32>, vector<4x256xf32>, vector<4x256xf32> -> vector<36x256xf32>
    %61 = arith.truncf %60 : vector<36x256xf32> to vector<36x256xbf16>
    %cst_20 = arith.constant dense<0.000000e+00> : vector<16x256xf32>
    %62 = tpu.matmul %28, %61, %cst_20 {dimension_numbers = #tpu.dot_dimension_numbers<[1], [0], [0], [1], [0, 0, 1, 1], [], []>} : vector<16x36xbf16>, vector<36x256xbf16>, vector<16x256xf32> -> vector<16x256xf32>
    %63 = vector.broadcast %30 : vector<16x1xf32> to vector<16x256xf32>
    %64 = arith.addf %62, %63 : vector<16x256xf32>
    %cst_21 = arith.constant 0.000000e+00 : f32
    %65 = vector.broadcast %cst_21 : f32 to vector<16x256xf32>
    %66 = arith.maximumf %64, %65 : vector<16x256xf32>
    %c0_22 = arith.constant 0 : index
    %c0_23 = arith.constant 0 : index
    %c0_24 = arith.constant 0 : index
    %67 = vector.load %arg6[%c0_22, %c0_23, %c0_24] : memref<1x16x256xf32, #tpu.memory_space<vmem>>, vector<1x16x256xf32>
    %68 = vector.shape_cast %67 : vector<1x16x256xf32> to vector<16x256xf32>
    %69 = vector.shape_cast %66 : vector<16x256xf32> to vector<1x16x256xf32>
    tpu.vector_store %arg6[%c0_22, %c0_23, %c0_24], %69 {strides = array<i32>} : memref<1x16x256xf32, #tpu.memory_space<vmem>>, vector<1x16x256xf32>,
    return
  }
  func.func @transform_0(%arg0: i32) -> (i32, i32, i32) {
    %c0_i32 = arith.constant 0 : i32
    %c0_i32_0 = arith.constant 0 : i32
    %c0_i32_1 = arith.constant 0 : i32
    return %arg0, %c0_i32, %c0_i32_0 : i32, i32, i32
  }
  func.func @transform_1(%arg0: i32) -> (i32, i32) {
    %c0_i32 = arith.constant 0 : i32
    %c0_i32_0 = arith.constant 0 : i32
    %c0_i32_1 = arith.constant 0 : i32
    return %c0_i32, %c0_i32_0 : i32, i32
  }
  func.func @transform_2(%arg0: i32) -> (i32, i32) {
    %c0_i32 = arith.constant 0 : i32
    %c0_i32_0 = arith.constant 0 : i32
    %c0_i32_1 = arith.constant 0 : i32
    return %c0_i32, %c0_i32_0 : i32, i32
  }
  func.func @transform_3(%arg0: i32) -> (i32, i32) {
    %c0_i32 = arith.constant 0 : i32
    %c0_i32_0 = arith.constant 0 : i32
    %c0_i32_1 = arith.constant 0 : i32
    return %c0_i32, %c0_i32_0 : i32, i32
  }
  func.func @transform_4(%arg0: i32) -> (i32, i32) {
    %c0_i32 = arith.constant 0 : i32
    %c0_i32_0 = arith.constant 0 : i32
    %c0_i32_1 = arith.constant 0 : i32
    return %c0_i32, %c0_i32_0 : i32, i32
  }
  func.func @transform_5(%arg0: i32) -> (i32, i32, i32) {
    %c0_i32 = arith.constant 0 : i32
    %c0_i32_0 = arith.constant 0 : i32
    %c0_i32_1 = arith.constant 0 : i32
    return %arg0, %c0_i32, %c0_i32_0 : i32, i32, i32
  }
}

</mosaic_0001>

<bundles_post_ra>
// kernel: tpu_custom_call.1
= control target key start
LH: loop header
LB: loop body
LE: loop exit
PB: predicated region body
PF: predicated region fallthrough
CT: control target
= control target key end

     0   :  { %10 = vsyncpa [#allocation3], 0  ;;  %s1128_s0 = inlined_call_operand.vmem [shape: bf16[2,4,256], index: 0, kind: input, shape index: {}]   ;;  %s1129_s1 = inlined_call_operand.vmem [shape: bf16[4,4], index: 1, kind: input, shape index: {}]   ;;  %s1130_s2 = inlined_call_operand.vmem [shape: f32[4,1], index: 2, kind: input, shape index: {}]   ;;  %s1131_s3 = inlined_call_operand.vmem [shape: bf16[16,36], index: 3, kind: input, shape index: {}]   ;;  %s1132_s4 = inlined_call_operand.vmem [shape: f32[16,1], index: 4, kind: input, shape index: {}]   ;;  %s1133_s5 = inlined_call_operand.hbm [shape: f32[2,16,256], index: 5, kind: output, shape index: {}]  }
   0x1   :  { %12 = vsyncpa [#allocation3 + $0x1], 0  ;;  %s932_s18 = smov 0   ;;  %s934_s19 = smov 0  }
   0x2   :  { %s936_s20 = smov 0   ;;  %s938_s21 = smov 0  }
   0x3 LB: > { %s953_s22 = sadd.s32 4294967295, %s883_s21   ;;  %s683_s23 = sadd.s32 4294967294, %s883_s21   ;;  %s883_s21 = sphi %s938_s21, %s1139_s21   ;;  %s879_s20 = sphi %s936_s20, %s1138_s20   ;;  %s875_s19 = sphi %s934_s19, %s1137_s19   ;;  %s871_s18 = sphi %s932_s18, %s1136_s18  }
   0x4   : > { %s957_s24 = sadd.s32 1, %s883_s21   ;;  %s135_s25 = sadd.s32 1, %s879_s20 }
   0x5   : > { %s132_s26 = ssub.s32 %s883_s21, %s957_s24  ;;  %p145_p0 = scmp.ne.s32.totalorder %s879_s20, %s875_s19 }
   0x6   : > { %p133_p1 = scmp.eq.s32.totalorder %s132_s26, 0  ;;  %p146_p2 = scmp.eq.s32.totalorder %s953_s22, 1 }
   0x7   : > { %p151_p3 = scmp.ne.s32.totalorder %s875_s19, %s871_s18  ;;  %p152_p4 = scmp.eq.s32.totalorder %s683_s23, 1 }
   0x8   : > { %s968_s27 = scalar_select %p133_p1, %s879_s20, %s135_s25  }
   0x9   : > { %p970_p5 = por %p146_p2, %p145_p0  ;;  %p974_p6 = por %p152_p4, %p151_p3 }
   0xa   : > { %p686_p7 = scmp.ge.s32.totalorder %s883_s21, 1  ;;  %p190_p8 = scmp.lt.s32.totalorder %s883_s21, 3 }
   0xc   : > { %p191_p9 = pnand %p686_p7, %p190_p8 }
   0xd   : > { %p218_p10 = scmp.lt.s32.totalorder (!%p191_p9), %s953_s22, 1  ;;  %v885_v0 = vmov (!%p191_p9), 0   ;;  %v262_v1 = vld [vmem:[%s1130_s2] sm:$0xf] (!%p191_p9)  ;;  %vm284_vm0 = vcmask (!%p191_p9), 1041408   ;;  %vm280_vm1 = vcmask (!%p191_p9), 31744   ;;  %v224_v6 = vlaneseq (!%p191_p9) }
   0xe   : > { %194 = sbr.rel (%p191_p9) target bundleno = 753 (0x2f1), region = 40  ;;  %323 = vmatprep.mubr.bf16.mxu0 (!%p191_p9), %v885_v0  ;;  %758 = vset.pattern.permute.xlu0 (!%p191_p9), %v885_v0  ;;  %v259_v5 = vld [vmem:[%s1129_s1] sm:$0x3] (!%p191_p9)  ;;  %v886_v11 = vmov (!%p191_p9), 0.0   ;;  %s887_s14 = smov (!%p191_p9), 16   ;;  %vm340_vm6 = vcmask (!%p191_p9), 138240  }
   0xf   : > { %268 = vperm.xlu0 (!%p191_p9), %758, %v262_v1   ;;  %588 = vmatprep.mubr.bf16.mxu1 (!%p191_p9), %v885_v0  ;;  %v225_v7 = vand.u32 (!%p191_p9), 127, %v224_v6  ;;  %s888_s15 = smov (!%p191_p9), 17   ;;  %s889_s16 = smov (!%p191_p9), 2   ;;  %vm369_vm7 = vcmask (!%p191_p9), 130048   ;;  %vm355_vm8 = vcmask (!%p191_p9), 15360   ;;  %vm393_vm9 = vcmask (!%p191_p9), 261120  }
  0x10   : > { %819 = vset.pattern.permute.xlu1 (!%p191_p9), %v885_v0  ;;  %s890_s17 = smov (!%p191_p9), 18   ;;  %s891_s23 = smov (!%p191_p9), 32   ;;  %vm381_vm10 = vcmask (!%p191_p9), 146432   ;;  %vm405_vm11 = vcmask (!%p191_p9), 277504   ;;  %vm424_vm12 = vcmask (!%p191_p9), 1039360   ;;  %vm497_vm13 = vcmask (!%p191_p9), 777216  }
  0x11   : > { %v226_v8 = vadd.s32 (!%p191_p9), 128, %v225_v7  ;;  %v231_v9 = vand.u32 (!%p191_p9), 15, %v225_v7  ;;  %s892_s25 = smov (!%p191_p9), 34   ;;  %s893_s26 = smov (!%p191_p9), 127   ;;  %vm438_vm14 = vcmask (!%p191_p9), 1031168   ;;  %vm455_vm15 = vcmask (!%p191_p9), 916480  }
  0x12   : > { %s894_s30 = smov (!%p191_p9), 126   ;;  %s895_s6 = smov (!%p191_p9), 96  }
  0x13   : > { %v238_v10 = vand.u32 (!%p191_p9), 15, %v226_v8  ;;  %vm251_vm2 = vcmp.gt.s32.totalorder (!%p191_p9), %v231_v9, 0  ;;  %vm255_vm4 = vcmp.lt.s32.totalorder (!%p191_p9), %v231_v9, 15  ;;  %s898_s9 = smov (!%p191_p9), 110   ;;  %s899_s10 = smov (!%p191_p9), 94  }
  0x14   : > { %v993_v12 = vsel (!%p191_p9), %vm251_vm2, 1.0, %v886_v11  ;;  %v257_v15 = vsel (!%p191_p9), %vm255_vm4, 1.0, %v886_v11  ;;  %vm486_vm2 = vcmask (!%p191_p9), 785408   ;;  %vm511_vm4 = vcmask (!%p191_p9), 769024  }
  0x15   : > { %s219_s7 = scalar_select %p218_p10, %s953_s22, 1  ;;  %vm252_vm3 = vcmp.gt.s32.totalorder %v238_v10, 0  ;;  %vm256_vm5 = vcmp.lt.s32.totalorder %v238_v10, 15 }
  0x16   : > { %v995_v13 = vsel %vm252_vm3, 1.0, %v886_v11  ;;  %v258_v16 = vsel %vm256_vm5, 1.0, %v886_v11  ;;  %vm472_vm3 = vcmask 900096   ;;  %vm546_vm5 = vcmask 293888  }
  0x17   : > { %s701_s8 = sshll.u32 %s219_s7, 2  ;;  %v759_v14 = vpack.i.bf16 %v995_v13, %v993_v12  ;;  %v764_v17 = vpack.i.bf16 %v258_v16, %v257_v15  ;;  %s896_s7 = smov 95  }
  0x18   : > { %s222_s11 = scalar_lea.vmem %s1128_s0, %s701_s8  ;;  %s897_s8 = smov 112  }
  0x19   : > { %v690_v2 = vld.sshfl [vmem:[%s222_s11] sm:$0x33 pattern:$0x76325410]  ;;  %760 = vrot.lane.b32.xlu1 %v759_v14, %s887_s14  ;;  %s900_s11 = smov [#allocation2]  }
  0x1a   : > { %v279_v3 = vcombine.high %v690_v2, %v690_v2  ;;  %v286_v4 = vsel %vm284_vm0, %v690_v2, 0  ;;  %s825_s12 = sshll.u32 %s900_s11, 4  ;;  %s826_s12 = int_to_ptr.vmem [resolvable:$false] %s825_s12 }
  0x1b   : > { %s827_s13 = scalar_lea.vmem %s826_s12, 1024 }
  0x1c   : > { %691 = vmatprep.subr.msk.bf16.mxu0 %vm284_vm0, %v279_v3 }
  0x1d   : > { %292 = vmatpush1.bf16.msra.mxu0 %v286_v4 }
  0x20   : > { %692 = vmatmul.mubr.msk.bf16.vlgmr.msra.gmra.mrb[0].mxu0 %vm280_vm1, %v259_v5  ;;  %vm516_vm1 = vcmask 1043456  }
  0x8b   : > { %v761_v27 = vpop.permute.xlu1 %760 }
  0x8c   : > { %v763_v31 = vunpack.i.h.bf16 %v761_v27  ;;  %v762_v32 = vunpack.i.l.bf16 %v761_v27 }
  0x8e   : > { %v269_v18 = vpop.permute.xlu0 %268  ;;  %v370_v40 = vsel %vm369_vm7, %v762_v32, %v763_v31 }
  0xf3   : > { %v325_v19 = vpop.f32.mrb[0].mxu0 }
  0xf4   : > { %v1000_v20 = vadd.f32 %v325_v19, %v269_v18  ;;  %v327_v21 = vpop.f32.mrb[1].mxu0 }
  0xf5   : > { %v1002_v22 = vadd.f32 %v327_v21, %v269_v18  ;;  %v329_v23 = vpop.f32.mrb[2].mxu0  ;;  %v263_v21 = vld [vmem:[%s1132_s4] sm:$0xff] }
  0xf6   : > { %v332_v24 = vmax.f32 %v1000_v20, 0.0  ;;  %v330_v25 = vpop.f32.mrb[3].mxu0  ;;  %v264_v23 = vld [vmem:[%s1132_s4 + $0x8] sm:$0xff]  ;;  %v820_v20 = vld [vmem:[%s1131_s3] sm:$0xff]  }
  0xf7   : > { %v333_v26 = vmax.f32 %v1002_v22, 0.0 }
  0xf8   : > { %336 = vrot.lane.b32.xlu0 %v332_v24, %s888_s15 }
  0xf9   : > { %338 = vrot.lane.b32.xlu1 %v333_v26, %s888_s15 }
  0xfc   : > { %765 = vrot.lane.b32.xlu0 %v764_v17, %s889_s16 }
  0xfd   : > { %770 = vrot.lane.b32.xlu1 %v764_v17, %s890_s17 }
 0x100   : > { %775 = vrot.lane.b32.xlu0 %v759_v14, %s891_s23  ;;  %s215_s23 = sand.u32 1, %s875_s19  }
 0x101   : > { %780 = vrot.lane.b32.xlu1 %v764_v17, %s892_s25  ;;  %s687_s25 = sshll.u32 %s215_s23, 5 }
 0x16a   : > { %v337_v28 = vpop.permute.xlu0 %336 }
 0x16b   : > { %v1010_v29 = vsel %vm340_vm6, 0.0, %v337_v28  ;;  %v339_v30 = vpop.permute.xlu1 %338 }
 0x16c   : > { %v415_v33 = vrot.slane %v1010_v29, 4  ;;  %v1013_v34 = vsel %vm340_vm6, %v337_v28, %v339_v30  ;;  %v1015_v35 = vsel %vm340_vm6, %v339_v30, 0.0  ;;  %v374_v61 = vmul.f32 %v762_v32, %v1010_v29 }
 0x16d   : > { %v416_v41 = vrot.slane %v1013_v34, 4  ;;  %v417_v45 = vrot.slane %v1015_v35, 4  ;;  %v375_v53 = vmul.f32 %v370_v40, %v1013_v34  ;;  %v376_v57 = vmul.f32 %v763_v31, %v1015_v35 }
 0x16e   : > { %418 = vrot.lane.b32.xlu1 %v415_v33, %s893_s26  ;;  %v766_v36 = vpop.permute.xlu0 %765  ;;  %v446_v4 = vrot.slane %v374_v61, 4 }
 0x16f   : > { %v768_v37 = vunpack.i.h.bf16 %v766_v36  ;;  %v767_v38 = vunpack.i.l.bf16 %v766_v36  ;;  %v771_v39 = vpop.permute.xlu1 %770  ;;  %v784_v56 = vpack.i.bf16 %v417_v45, %v416_v41  ;;  %v447_v63 = vrot.slane %v375_v53, 4 }
 0x170   : > { %v773_v46 = vunpack.i.h.bf16 %v771_v39  ;;  %v772_v47 = vunpack.i.l.bf16 %v771_v39  ;;  %v448_v0 = vrot.slane %v376_v57, 4  ;;  %v348_v36 = vmul.f32 %v1013_v34, %v995_v13 }
 0x171   : > { %v362_v42 = vmul.f32 %v768_v37, %v1015_v35  ;;  %v356_v43 = vsel %vm355_vm8, %v767_v38, %v768_v37  ;;  %v360_v44 = vmul.f32 %v767_v38, %v1010_v29  ;;  %v347_v13 = vmul.f32 %v1010_v29, %v993_v12 }
 0x172   : > { %v776_v48 = vpop.permute.xlu0 %775  ;;  %v361_v49 = vmul.f32 %v356_v43, %v1013_v34  ;;  %v382_v58 = vsel %vm381_vm10, %v772_v47, %v773_v46  ;;  %v388_v62 = vmul.f32 %v773_v46, %v1015_v35  ;;  %v386_v3 = vmul.f32 %v772_v47, %v1010_v29 }
 0x173   : > { %v778_v50 = vunpack.i.h.bf16 %v776_v48  ;;  %v777_v51 = vunpack.i.l.bf16 %v776_v48  ;;  %432 = vrot.lane.b32.xlu0 %v360_v44, %s894_s30  ;;  %v387_v1 = vmul.f32 %v382_v58, %v1013_v34  ;;  %v781_v2 = vpop.permute.xlu1 %780  ;;  %v804_v6 = vpack.i.bf16 %v448_v0, %v447_v63 }
 0x174   : > { %v789_v52 = vpack.i.bf16 %v362_v42, %v361_v49  ;;  %v465_v5 = vrot.slane %v388_v62, 4  ;;  %v783_v8 = vunpack.i.h.bf16 %v781_v2  ;;  %v782_v9 = vunpack.i.l.bf16 %v781_v2 }
 0x175   : > { %v400_v54 = vmul.f32 %v778_v50, %v1015_v35  ;;  %v394_v55 = vsel %vm393_vm9, %v777_v51, %v778_v50  ;;  %v464_v7 = vrot.slane %v387_v1, 4  ;;  %v463_v10 = vrot.slane %v386_v3, 4 }
 0x176   : > { %790 = vrot.lane.b32.xlu1 %v789_v52, %s894_s30  ;;  %v399_v59 = vmul.f32 %v394_v55, %v1013_v34  ;;  %v406_v14 = vsel %vm405_vm11, %v782_v9, %v783_v8  ;;  %v398_v15 = vmul.f32 %v777_v51, %v1010_v29  ;;  %v410_v16 = vmul.f32 %v782_v9, %v1010_v29 }
 0x177   : > { %785 = vrot.lane.b32.xlu0 %v784_v56, %s893_s26  ;;  %v809_v11 = vpack.i.bf16 %v465_v5, %v464_v7  ;;  %v411_v17 = vmul.f32 %v406_v14, %v1013_v34  ;;  %v412_v18 = vmul.f32 %v783_v8, %v1015_v35  ;;  %s217_s26 = scalar_lea.vmem [#allocation2], %s687_s25 }
 0x178   : > { %v794_v60 = vpack.i.bf16 %v400_v54, %v399_v59  ;;  %s621_s30 = sshll.u32 %s217_s26, 4  ;;  %s1079_s30 = int_to_ptr.vmem [resolvable:$true] %s621_s30 }
 0x179   : > { %v814_v19 = vpack.i.bf16 %v411_v17, %v410_v16  ;;  %p828_p0 = scmp.lt.s32.totalorder %s1079_s30, %s826_s12 }
 0x17a   : > { %795 = vrot.lane.b32.xlu1 %v794_v60, %s895_s6 }
 0x17b   : > { %800 = vrot.lane.b32.xlu0 %v784_v56, %s896_s7 }
 0x17e   : > { %449 = vrot.lane.b32.xlu1 %v446_v4, %s897_s8 }
 0x17f   : > { %805 = vrot.lane.b32.xlu0 %v804_v6, %s897_s8 }
 0x182   : > { %466 = vrot.lane.b32.xlu1 %v463_v10, %s898_s9 }
 0x183   : > { %810 = vrot.lane.b32.xlu0 %v809_v11, %s898_s9 }
 0x186   : > { %491 = vrot.lane.b32.xlu1 %v415_v33, %s896_s7 }
 0x187   : > { %480 = vrot.lane.b32.xlu0 %v398_v15, %s895_s6  ;;  %s702_s6 = sshll.u32 %s953_s22, 9  ;;  %s821_s22 = scalar_lea.vmem %s1079_s30, 512 }
 0x188   : > { %s1084_s9 = scalar_lea.hbm %s1133_s5, %s702_s6  ;;  %p822_p11 = scmp.ne.s32.totalorder %s1079_s30, %s821_s22 }
 0x189   : > { %p829_p1 = scmp.lt.s32.totalorder %s827_s13, %s821_s22 }
 0x18a   : > { %509 = vrot.lane.b32.xlu1 %v412_v18, %s899_s10  ;;  %p823_p12 = pnand %p822_p11, %p970_p5 }
 0x18b   : > { %815 = vrot.lane.b32.xlu0 %v814_v19, %s899_s10  ;;  %s1086_s10 = scalar_lea.sflag [#allocation3], %s215_s23  ;;  %p830_p2 = por %p829_p1, %p828_p0 }
 0x18c   : > { %p824_p13 = pneg %p823_p12 }
 0x18e   : > { %538 = vperm.xlu1 %819, %v264_v23   ;;  %p831_p3 = pnand %p830_p2, %p824_p13 }
 0x18f   : > { %533 = vperm.xlu0 %758, %v263_v21  }
 0x1e0   : > { %v419_v25 = vpop.permute.xlu1 %418 }
 0x1e5   : > { %v433_v27 = vpop.permute.xlu0 %432 }
 0x1e8   : > { %v791_v28 = vpop.permute.xlu1 %790 }
 0x1e9   : > { %v786_v30 = vpop.permute.xlu0 %785  ;;  %v793_v37 = vunpack.i.h.bf16 %v791_v28  ;;  %v792_v38 = vunpack.i.l.bf16 %v791_v28 }
 0x1ea   : > { %v788_v31 = vunpack.i.h.bf16 %v786_v30  ;;  %v787_v32 = vunpack.i.l.bf16 %v786_v30 }
 0x1eb   : > { %v440_v34 = vsel %vm438_vm14, %v792_v38, %v793_v37  ;;  %v439_v49 = vsel %vm438_vm14, %v433_v27, %v792_v38 }
 0x1ec   : > { %v796_v33 = vpop.permute.xlu1 %795  ;;  %v426_v40 = vsel %vm424_vm12, %v787_v32, %v788_v31  ;;  %v425_v41 = vsel %vm424_vm12, %v419_v25, %v787_v32 }
 0x1ed   : > { %v801_v35 = vpop.permute.xlu0 %800  ;;  %v798_v42 = vunpack.i.h.bf16 %v796_v33  ;;  %v797_v43 = vunpack.i.l.bf16 %v796_v33  ;;  %v518_v52 = vsel %vm516_vm1, %v348_v36, %v426_v40  ;;  %v517_v54 = vsel %vm516_vm1, %v347_v13, %v425_v41 }
 0x1ee   : > { %v803_v44 = vunpack.i.h.bf16 %v801_v35  ;;  %v802_v45 = vunpack.i.l.bf16 %v801_v35 }
 0x1ef   : > { %v488_v12 = vsel %vm486_vm2, %v797_v43, %v798_v42 }
 0x1f0   : > { %v450_v39 = vpop.permute.xlu1 %449  ;;  %v499_v56 = vsel %vm497_vm13, %v802_v45, %v803_v44 }
 0x1f1   : > { %v806_v46 = vpop.permute.xlu0 %805  ;;  %v524_v4 = vsel %vm516_vm1, %v488_v12, %v499_v56 }
 0x1f2   : > { %v808_v47 = vunpack.i.h.bf16 %v806_v46  ;;  %v807_v48 = vunpack.i.l.bf16 %v806_v46 }
 0x1f4   : > { %v467_v50 = vpop.permute.xlu1 %466  ;;  %v457_v51 = vsel %vm455_vm15, %v807_v48, %v808_v47  ;;  %v456_v53 = vsel %vm455_vm15, %v450_v39, %v807_v48 }
 0x1f5   : > { %v811_v55 = vpop.permute.xlu0 %810  ;;  %v520_v57 = vsel %vm516_vm1, %v440_v34, %v457_v51  ;;  %v519_v29 = vsel %vm516_vm1, %v439_v49, %v456_v53 }
 0x1f6   : > { %v813_v58 = vunpack.i.h.bf16 %v811_v55  ;;  %v812_v59 = vunpack.i.l.bf16 %v811_v55  ;;  %v526_v60 = vpack.c.bf16 %v520_v57, %v518_v52  ;;  %v525_v61 = vpack.c.bf16 %v519_v29, %v517_v54 }
 0x1f8   : > { %v473_v62 = vsel %vm472_vm3, %v467_v50, %v812_v59  ;;  %v474_v63 = vsel %vm472_vm3, %v812_v59, %v813_v58  ;;  %v492_v0 = vpop.permute.xlu1 %491  ;;  %556 = vmatprep.subr.bf16.mxu1 %v526_v60 }
 0x1f9   : > { %v498_v1 = vsel %vm497_vm13, %v492_v0, %v802_v45  ;;  %v481_v2 = vpop.permute.xlu0 %480  ;;  %557 = vmatpush1.bf16.msra.mxu1 %v525_v61  ;;  %v522_v3 = vsel %vm516_vm1, %v333_v26, %v474_v63  ;;  %v521_v8 = vsel %vm516_vm1, %v332_v24, %v473_v62 }
 0x1fa   : > { %v487_v5 = vsel %vm486_vm2, %v481_v2, %v797_v43  ;;  %v528_v6 = vpack.c.bf16 %v524_v4, %v522_v3 }
 0x1fb   : > { %v523_v7 = vsel %vm516_vm1, %v487_v5, %v498_v1 }
 0x1fc   : > { %558 = vmatprep.subr.bf16.mxu1 %v528_v6  ;;  %v527_v9 = vpack.c.bf16 %v523_v7, %v521_v8  ;;  %v510_v26 = vpop.permute.xlu1 %509 }
 0x1fd   : > { %v816_v10 = vpop.permute.xlu0 %815 }
 0x1fe   : > { %v818_v11 = vunpack.i.h.bf16 %v816_v10  ;;  %v817_v22 = vunpack.i.l.bf16 %v816_v10  ;;  %559 = vmatpush1.bf16.msra.mxu1 %v527_v9 }
 0x200   : > { %v513_v14 = vsel %vm511_vm4, %v818_v11, %v510_v26  ;;  %v512_v15 = vsel %vm511_vm4, %v817_v22, %v818_v11 }
 0x201   : > { %v530_v16 = vpack.c.bf16 %v513_v14, %v513_v14  ;;  %v529_v17 = vpack.c.bf16 %v512_v15, %v512_v15 }
 0x203   : > { %694 = vmatprep.subr.msk.bf16.mxu1 %vm284_vm0, %v530_v16  ;;  %v551_v18 = vsel %vm284_vm0, %v529_v17, 0 }
 0x204   : > { %561 = vmatpush1.bf16.msra.mxu1 %v551_v18 }
 0x207   : > { %695 = vmatmul.mubr.msk.bf16.vlgmr.msra.gmra.mrb[0].mxu1 %vm546_vm5, %v820_v20 }
 0x20d   : > { %v539_v21 = vpop.permute.xlu1 %538 }
 0x20e   : > { %v534_v24 = vpop.permute.xlu0 %533 }
 0x2da   : > { %v590_v19 = vpop.f32.mrb[0].mxu1 }
 0x2db   : > { %v591_v23 = vadd.f32 %v590_v19, %v534_v24  ;;  %v592_v25 = vpop.f32.mrb[1].mxu1 }
 0x2dc   : > { %v593_v27 = vadd.f32 %v592_v25, %v534_v24  ;;  %v594_v28 = vpop.f32.mrb[2].mxu1 }
 0x2dd   : > { %v599_v30 = vmax.f32 %v591_v23, 0.0  ;;  %v595_v31 = vadd.f32 %v594_v28, %v539_v21  ;;  %v596_v32 = vpop.f32.mrb[3].mxu1 }
 0x2de   : > { %v600_v33 = vmax.f32 %v593_v27, 0.0  ;;  %v597_v35 = vadd.f32 %v596_v32, %v539_v21 }
 0x2df   : > { %603 = vst [vmem:[%s217_s26] sm:$0xff] %v599_v30  ;;  %v601_v36 = vmax.f32 %v595_v31, 0.0 }
 0x2e0   : > { %604 = vst [vmem:[%s217_s26 + $0x8] sm:$0xff] %v600_v33  ;;  %v602_v37 = vmax.f32 %v597_v35, 0.0 }
 0x2e1   : > { %605 = vst [vmem:[%s217_s26 + $0x10] sm:$0xff] %v601_v36 }
 0x2e2   : > { %606 = vst [vmem:[%s217_s26 + $0x18] sm:$0xff] %v602_v37 }
 0x2e3   : > { %834 = shalt.err (!%p831_p3)
}
 0x2e4   : > { %s835_s15 = scalar_lea.hbm %s1084_s9, 512  ;;  %s839_s23 = scalar_lea.hbm %s1133_s5, 1024 }
 0x2e5   : > { %p836_p4 = scmp.ne.s32.totalorder %s1084_s9, %s835_s15  ;;  %p840_p9 = scmp.lt.u32.totalorder %s1084_s9, %s1133_s5 }
 0x2e6   : > { %p841_p10 = scmp.lt.u32.totalorder %s839_s23, %s835_s15  ;;  %p843_p12 = scmp.lt.u32.totalorder %s835_s15, %s1084_s9 }
 0x2e7   : > { %p837_p7 = pnand %p836_p4, %p970_p5 }
 0x2e8   : > { %p842_p11 = por %p841_p10, %p840_p9 }
 0x2e9   : > { %p838_p8 = pneg %p837_p7 }
 0x2ea   : > { %p844_p13 = por %p843_p12, %p842_p11 }
 0x2ec   : > { %p845_p0 = pnand %p844_p13, %p838_p8 }
 0x2ee   : > { %848 = shalt.err (!%p845_p0)
}
 0x2ef   : > { %s901_s6 = smov 256  }
 0x2f0   : > { %703 = dma.vmem_to_hbm [thread:$0]  (%p970_p5), %s1079_s30, 512, %s1084_s9, %s1086_s10, %s901_s6, %s901_s6, %s887_s14  }
 0x2f1 PF: > { %p709_p1 = scmp.ge.s32.totalorder %s883_s21, 2  ;;  %s636_s7 = sand.u32 1, %s871_s18  }
 0x2f2   : > { %s637_s8 = scalar_lea.sflag [#allocation3], %s636_s7 }
 0x2f3   : > { %p706_p2 = pnand %p709_p1, %p974_p6 }
 0x2f5   : > { %866 = dma.done.wait (!%p706_p2), %s637_s8, 512  }
 0x2f6   : > { %868 = vsyncadd (!%p706_p2), %s637_s8, 4294966784  ;;  %p15_p3 = scmp.ge.s32.totalorder %s957_s24, 4   ;;  %s1136_s18 = smov %s875_s19 }
 0x2f7   : > { %s1137_s19 = smov %s879_s20  ;;  %s1138_s20 = smov %s968_s27 }
 0x2f8   : > { %s1139_s21 = smov %s957_s24  ;;  %17 = sbr.rel (!%p15_p3) target bundleno = 3 (0x3), region = 75 }
 0x2ff   :  { %642 = vsyncpa [#allocation3], 1 }
 0x300   :  { %644 = vsyncpa [#allocation3 + $0x1], 1 }

</bundles_post_ra>
